<compile_context>
chip_gen: v5e
topology: v5e:2x2
jax: 0.10.0
libtpu: 0.0.40
codegen_flags: <defaults>
</compile_context>

<pallas_src>
import functools
import math

import jax
import jax.numpy as jnp
from jax import lax
from jax.experimental import pallas as pl
from jax.experimental.pallas import tpu as pltpu


_LOGITS_TILE_BYTES = 2 * 1024 * 1024   # ~2 MiB per logits buffer (HBM-streaming regime)
_MIN_GRID_STEPS = 8                    # keep enough steps for pipelining + both v7x TCs


@functools.lru_cache(maxsize=1)
def _vmem_limit_bytes():
    """Generation-aware scoped-VMEM ceiling (half of physical, clamped)."""
    try:
        cap = int(pltpu.get_tpu_info().vmem_capacity_bytes)
    except Exception:
        cap = 64 * 1024 * 1024  # conservative if the query is unavailable
    return int(min(48 * 1024 * 1024, max(16 * 1024 * 1024, cap // 2)))


@functools.lru_cache(maxsize=1)
def _bf16_math_supported():
    """bf16 VPU/EUP paths exist on v6e / v7x; keep f32 math on older chips."""
    try:
        kind = jax.devices()[0].device_kind.lower()
        return any(t in kind for t in ("v6", "v7", "tpu6", "tpu7"))
    except Exception:
        return False


def _pick_tile_s(s, n, c, itemsize):
    """Spatial tile for the (N, C, S) layout: ~2 MiB logits block, lane-aligned."""
    t = max(128, (_LOGITS_TILE_BYTES // max(1, c * itemsize)) // 128 * 128)
    # Keep enough total grid steps so both v7x TensorCores participate and the
    # BlockSpec pipeline can actually overlap DMA with compute.
    if n * pl.cdiv(s, t) < _MIN_GRID_STEPS and s > 128:
        steps = -(-_MIN_GRID_STEPS // n)                 # ceil
        t = min(t, max(128, (-(-s // steps)) // 128 * 128))
    return int(min(t, s))


def _pick_tile_m(m, c, itemsize):
    """Row tile for the 2-D (M, C) layout (large C only)."""
    t = max(8, (_LOGITS_TILE_BYTES // max(1, c * itemsize)) // 8 * 8)
    if pl.cdiv(m, t) < _MIN_GRID_STEPS and m > 8:
        t = min(t, max(8, (-(-m // _MIN_GRID_STEPS)) // 8 * 8))
    return int(min(t, m))


# ----------------------------------------------------------------------------------
# Kernel for the native (N, C, S) layout: class axis on sublanes, spatial axis on
# lanes (lane-dense for small C, no wrapper transpose for >2-D inputs).
# ----------------------------------------------------------------------------------
def _ce_kernel_ncs(logits_ref, target_ref, out_ref, *, s_valid, tile_s, ragged, bf16_math):
    x = logits_ref[0]                                        # (C, tile_s), native dtype
    tgt = target_ref[0]                                      # (1, tile_s) int32
    c = x.shape[0]

    # Target-class selection mask: (C,1) iota broadcast against the (1,tile_s) target
    # row -> no full (C, tile_s) int32 tensor is materialized.
    cls_ids = lax.broadcasted_iota(jnp.int32, (c, 1), 0)
    sel = cls_ids == tgt                                     # (C, tile_s) bool

    if bf16_math:
        # max / subtract / exp in bf16 (VPU + EUP bf16 paths); accumulate in f32.
        m = jnp.max(x, axis=0, keepdims=True)                # (1, tile_s) bf16
        e = jnp.exp(x - m)                                   # (C, tile_s) bf16
        sum_e = jnp.sum(e, axis=0, keepdims=True, dtype=jnp.float32)
        lse = jnp.log(sum_e) + m.astype(jnp.float32)
        picked = jnp.sum(jnp.where(sel, x, jnp.zeros((), x.dtype)),
                         axis=0, keepdims=True, dtype=jnp.float32)
    else:
        xf = x.astype(jnp.float32)                           # no-op for f32 inputs
        m = jnp.max(xf, axis=0, keepdims=True)
        lse = jnp.log(jnp.sum(jnp.exp(xf - m), axis=0, keepdims=True)) + m
        picked = jnp.sum(jnp.where(sel, xf, 0.0), axis=0, keepdims=True)

    loss = lse - picked                                      # (1, tile_s) f32

    if ragged:  # static: only emitted when S % tile_s != 0
        s_ids = pl.program_id(1) * tile_s + lax.broadcasted_iota(jnp.int32, loss.shape, 1)
        loss = jnp.where(s_ids < s_valid, loss, 0.0)

    # Lane-padded partial-sum row (partial in lane 0) -> one unmasked full-lane store.
    lane = lax.broadcasted_iota(jnp.int32, (1, 128), 1)
    out_ref[0, 0] = jnp.where(lane == 0, jnp.sum(loss), 0.0)


def _ce_sum_ncs(logits3, target3, tile_s=None):
    n, c, s = (int(d) for d in logits3.shape)
    if tile_s is None:
        tile_s = _pick_tile_s(s, n, c, logits3.dtype.itemsize)
    tile_s = int(min(int(tile_s), s))
    if tile_s < s:
        tile_s = min(s, max(128, (tile_s // 128) * 128))     # keep lane-aligned blocks
    grid_s = pl.cdiv(s, tile_s)
    ragged = (s % tile_s) != 0
    bf16_math = (logits3.dtype == jnp.bfloat16) and _bf16_math_supported()

    # TODO(synk): for vocab-scale C (block (C, tile_s) no longer fits VMEM) this needs a
    # class-chunked grid axis with an online (flash-style) logsumexp.
    kernel = functools.partial(_ce_kernel_ncs, s_valid=s, tile_s=tile_s,
                               ragged=ragged, bf16_math=bf16_math)
    partials = pl.pallas_call(
        kernel,
        out_shape=jax.ShapeDtypeStruct((n, grid_s, 1, 128), jnp.float32),
        grid_spec=pltpu.PrefetchScalarGridSpec(
            num_scalar_prefetch=0,
            grid=(n, grid_s),
            in_specs=[
                pl.BlockSpec((1, c, tile_s), lambda i, j: (i, 0, j)),
                pl.BlockSpec((1, 1, tile_s), lambda i, j: (i, 0, j)),
            ],
            out_specs=pl.BlockSpec((1, 1, 1, 128), lambda i, j: (i, j, 0, 0)),
        ),
        compiler_params=pltpu.CompilerParams(
            dimension_semantics=("parallel", "parallel"),
            vmem_limit_bytes=_vmem_limit_bytes(),
        ),
    )(logits3, target3)
    return jnp.sum(partials)


# ----------------------------------------------------------------------------------
# Kernel for the 2-D (M, C) case with large C (rows on sublanes, classes on lanes).
# ----------------------------------------------------------------------------------
def _ce_kernel_rows(logits_ref, target_ref, out_ref, *, m_valid, tile_m, ragged, bf16_math):
    x = logits_ref[...]                                      # (tile_m, C), native dtype
    tgt = target_ref[...]                                    # (tile_m, 1) int32
    c = x.shape[1]

    cls_ids = lax.broadcasted_iota(jnp.int32, (1, c), 1)
    sel = cls_ids == tgt                                     # (tile_m, C) bool

    if bf16_math:
        m = jnp.max(x, axis=1, keepdims=True)
        e = jnp.exp(x - m)
        sum_e = jnp.sum(e, axis=1, keepdims=True, dtype=jnp.float32)
        lse = jnp.log(sum_e) + m.astype(jnp.float32)
        picked = jnp.sum(jnp.where(sel, x, jnp.zeros((), x.dtype)),
                         axis=1, keepdims=True, dtype=jnp.float32)
    else:
        xf = x.astype(jnp.float32)
        m = jnp.max(xf, axis=1, keepdims=True)
        lse = jnp.log(jnp.sum(jnp.exp(xf - m), axis=1, keepdims=True)) + m
        picked = jnp.sum(jnp.where(sel, xf, 0.0), axis=1, keepdims=True)

    loss = lse - picked                                      # (tile_m, 1) f32

    if ragged:  # static: only emitted when M % tile_m != 0
        row_ids = pl.program_id(0) * tile_m + lax.broadcasted_iota(jnp.int32, loss.shape, 0)
        loss = jnp.where(row_ids < m_valid, loss, 0.0)

    lane = lax.broadcasted_iota(jnp.int32, (1, 128), 1)
    out_ref[0] = jnp.where(lane == 0, jnp.sum(loss), 0.0)


def _ce_sum_rows(logits2, target2, tile_m=None):
    m, c = (int(d) for d in logits2.shape)
    if tile_m is None:
        tile_m = _pick_tile_m(m, c, logits2.dtype.itemsize)
    tile_m = int(min(int(tile_m), m))
    if tile_m < m:
        tile_m = max(8, (tile_m // 8) * 8)                   # keep sublane-aligned blocks
    grid_m = pl.cdiv(m, tile_m)
    ragged = (m % tile_m) != 0
    bf16_math = (logits2.dtype == jnp.bfloat16) and _bf16_math_supported()

    kernel = functools.partial(_ce_kernel_rows, m_valid=m, tile_m=tile_m,
                               ragged=ragged, bf16_math=bf16_math)
    partials = pl.pallas_call(
        kernel,
        out_shape=jax.ShapeDtypeStruct((grid_m, 1, 128), jnp.float32),
        grid_spec=pltpu.PrefetchScalarGridSpec(
            num_scalar_prefetch=0,
            grid=(grid_m,),
            in_specs=[
                pl.BlockSpec((tile_m, c), lambda i: (i, 0)),
                pl.BlockSpec((tile_m, 1), lambda i: (i, 0)),
            ],
            out_specs=pl.BlockSpec((1, 1, 128), lambda i: (i, 0, 0)),
        ),
        compiler_params=pltpu.CompilerParams(
            dimension_semantics=("parallel",),
            vmem_limit_bytes=_vmem_limit_bytes(),
        ),
    )(logits2, target2)
    return jnp.sum(partials)


# ----------------------------------------------------------------------------------
# Public wrapper matching the PyTorch module's forward pass.
# ----------------------------------------------------------------------------------
def cross_entropy_loss(logits, target, reduction='mean', *, tile_s=None, tile_m=None):
    if reduction not in ('mean', 'sum'):
        # TODO(synk): the module returns the unreduced (M, 1) loss for other reductions;
        # that path (per-element loss output) is not implemented here.
        raise NotImplementedError("reduction must be 'mean' or 'sum'")

    target = jnp.asarray(target, jnp.int32)

    if logits.ndim > 2:
        n, c = int(logits.shape[0]), int(logits.shape[1])
        s = math.prod(int(d) for d in logits.shape[2:])
        logits3 = logits.reshape(n, c, s)                    # free reshape, NO transpose
        target3 = target.reshape(n, 1, s)
        total = _ce_sum_ncs(logits3, target3, tile_s=tile_s)
        m_rows = n * s
    else:
        m_rows, c = int(logits.shape[0]), int(logits.shape[1])
        if c < 128:
            # Lane-sparse in (M, C); one wrapper transpose buys the lane-dense kernel.
            logits3 = jnp.transpose(logits, (1, 0)).reshape(1, c, m_rows)
            target3 = target.reshape(1, 1, m_rows)
            total = _ce_sum_ncs(logits3, target3, tile_s=tile_s)
        else:
            target2 = target.reshape(m_rows, 1)
            total = _ce_sum_rows(logits, target2, tile_m=tile_m)

    if reduction == 'mean':
        total = total / m_rows
    return total


def _reference(logits, target, reduction='mean'):
    """Pure-JAX reference mirroring the PyTorch forward."""
    if logits.ndim > 2:
        n, c = logits.shape[0], logits.shape[1]
        logits = logits.reshape(n, c, -1)
        logits = jnp.transpose(logits, (0, 2, 1)).reshape(-1, c)
    target = target.reshape(-1)
    logp = jax.nn.log_softmax(logits.astype(jnp.float32), axis=1)
    picked = jnp.take_along_axis(logp, target[:, None].astype(jnp.int32), axis=1)
    loss = -picked
    return loss.mean() if reduction == 'mean' else loss.sum()


if __name__ == "__main__":
    key = jax.random.PRNGKey(0)
    k1, k2, k3, k4, k5, k6 = jax.random.split(key, 6)

    # 1) 4-D logits (N, C, H, W) + integer targets — the module's main use case.
    N, C, H, W = 2, 4, 16, 16
    logits = jax.random.normal(k1, (N, C, H, W), dtype=jnp.float32)
    target = jax.random.randint(k2, (N, H, W), 0, C, dtype=jnp.int32)
    loss = jax.block_until_ready(cross_entropy_loss(logits, target, reduction='mean'))
    ref = _reference(logits, target, reduction='mean')
    assert jnp.allclose(loss, ref, rtol=1e-5, atol=1e-5), (loss, ref)

    # 2) Ragged spatial tiling (S=225 with forced tile_s=128) exercises the mask path.
    logits_r = jax.random.normal(k3, (2, 4, 15, 15), dtype=jnp.float32)
    target_r = jax.random.randint(k4, (2, 15, 15), 0, 4, dtype=jnp.int32)
    loss_r = jax.block_until_ready(
        cross_entropy_loss(logits_r, target_r, reduction='mean', tile_s=128))
    ref_r = _reference(logits_r, target_r, reduction='mean')
    assert jnp.allclose(loss_r, ref_r, rtol=1e-5, atol=1e-5), (loss_r, ref_r)

    # 3) 2-D small-C path (routed through the lane-dense NCS kernel) + 'sum'.
    logits2 = jax.random.normal(k3, (40, 7), dtype=jnp.float32)
    target2 = jax.random.randint(k4, (40,), 0, 7, dtype=jnp.int32)
    loss2 = jax.block_until_ready(cross_entropy_loss(logits2, target2, reduction='sum'))
    ref2 = _reference(logits2, target2, reduction='sum')
    assert jnp.allclose(loss2, ref2, rtol=1e-4, atol=1e-4), (loss2, ref2)

    # 4) 2-D large-C rows path, ragged row tiling (40 % 16 != 0).
    logits_lc = jax.random.normal(k5, (40, 256), dtype=jnp.float32)
    target_lc = jax.random.randint(k6, (40,), 0, 256, dtype=jnp.int32)
    loss_lc = jax.block_until_ready(
        cross_entropy_loss(logits_lc, target_lc, reduction='sum', tile_m=16))
    ref_lc = _reference(logits_lc, target_lc, reduction='sum')
    assert jnp.allclose(loss_lc, ref_lc, rtol=1e-4, atol=1e-4), (loss_lc, ref_lc)

    # 5) bf16 logits — exercises the bf16 math path on v6e/v7x (f32 fallback elsewhere).
    logits_b = jax.random.normal(k1, (N, C, H, W), dtype=jnp.bfloat16)
    loss_b = jax.block_until_ready(cross_entropy_loss(logits_b, target, reduction='mean'))
    ref_b = _reference(logits_b, target, reduction='mean')
    assert jnp.allclose(loss_b, ref_b, rtol=3e-2, atol=3e-2), (loss_b, ref_b)

    print("KERNEL_OK")
</pallas_src>

<mosaic_0001>
module attributes {stable_mosaic.version = 11 : i64} {
  func.func @_ce_kernel_ncs(%arg0: i32, %arg1: i32, %arg2: memref<1x4x128xf32, #tpu.memory_space<vmem>>, %arg3: memref<1x1x128xi32, #tpu.memory_space<vmem>>, %arg4: memref<1x1x1x128xf32, #tpu.memory_space<vmem>>) attributes {dimension_semantics = [#tpu.dimension_semantics<parallel>, #tpu.dimension_semantics<parallel>], iteration_bounds = array<i64: 2, 2>, scalar_prefetch = 0 : i64, scratch_operands = 0 : i64, tpu.core_type = #tpu.core_type<tc>, window_params = [{transform_indices = @transform_0, window_bounds = array<i64: 1, 4, 128>}, {transform_indices = @transform_1, window_bounds = array<i64: 1, 1, 128>}, {transform_indices = @transform_2, window_bounds = array<i64: 1, 1, 1, 128>}]} {
    %c0 = arith.constant 0 : index
    %c0_0 = arith.constant 0 : index
    %c0_1 = arith.constant 0 : index
    %0 = vector.load %arg2[%c0, %c0_0, %c0_1] : memref<1x4x128xf32, #tpu.memory_space<vmem>>, vector<1x4x128xf32>
    %1 = vector.shape_cast %0 : vector<1x4x128xf32> to vector<4x128xf32>
    %c0_2 = arith.constant 0 : index
    %c0_3 = arith.constant 0 : index
    %c0_4 = arith.constant 0 : index
    %2 = vector.load %arg3[%c0_2, %c0_3, %c0_4] : memref<1x1x128xi32, #tpu.memory_space<vmem>>, vector<1x1x128xi32>
    %3 = vector.shape_cast %2 : vector<1x1x128xi32> to vector<1x128xi32>
    %4 = tpu.iota {dimensions = array<i32: 0>} : vector<4x1xi32>
    %5 = vector.broadcast %4 : vector<4x1xi32> to vector<4x128xi32>
    %6 = vector.broadcast %3 : vector<1x128xi32> to vector<4x128xi32>
    %7 = arith.cmpi eq, %5, %6 : vector<4x128xi32>
    %cst = arith.constant dense<0xFF800000> : vector<128xf32>
    %8 = vector.multi_reduction <maximumf>, %1, %cst [0] : vector<4x128xf32> to vector<128xf32>
    %9 = vector.shape_cast %8 : vector<128xf32> to vector<1x128xf32>
    %10 = vector.broadcast %9 : vector<1x128xf32> to vector<4x128xf32>
    %11 = arith.subf %1, %10 : vector<4x128xf32>
    %12 = math.exp %11 : vector<4x128xf32>
    %cst_5 = arith.constant dense<0.000000e+00> : vector<128xf32>
    %13 = vector.multi_reduction <add>, %12, %cst_5 [0] : vector<4x128xf32> to vector<128xf32>
    %14 = vector.shape_cast %13 : vector<128xf32> to vector<1x128xf32>
    %15 = math.log %14 : vector<1x128xf32>
    %16 = arith.addf %15, %9 : vector<1x128xf32>
    %cst_6 = arith.constant 0.000000e+00 : f32
    %17 = vector.broadcast %cst_6 : f32 to vector<4x128xf32>
    %18 = arith.select %7, %1, %17 : vector<4x128xi1>, vector<4x128xf32>
    %cst_7 = arith.constant dense<0.000000e+00> : vector<128xf32>
    %19 = vector.multi_reduction <add>, %18, %cst_7 [0] : vector<4x128xf32> to vector<128xf32>
    %20 = vector.shape_cast %19 : vector<128xf32> to vector<1x128xf32>
    %21 = arith.subf %16, %20 : vector<1x128xf32>
    %22 = tpu.iota {dimensions = array<i32: 1>} : vector<1x128xi32>
    %c0_i32 = arith.constant 0 : i32
    %23 = vector.broadcast %c0_i32 : i32 to vector<1x128xi32>
    %24 = arith.cmpi eq, %22, %23 : vector<1x128xi32>
    %25 = vector.shape_cast %21 : vector<1x128xf32> to vector<1x1x128xf32>
    %cst_8 = arith.constant dense<0.000000e+00> : vector<1xf32>
    %26 = vector.multi_reduction <add>, %25, %cst_8 [1, 2] : vector<1x1x128xf32> to vector<1xf32>
    %27 = vector.shape_cast %26 : vector<1xf32> to vector<1x1x1xf32>
    %28 = vector.extract %27[0, 0, 0] : f32 from vector<1x1x1xf32>
    %cst_9 = arith.constant 0.000000e+00 : f32
    %29 = vector.broadcast %28 : f32 to vector<1x128xf32>
    %30 = vector.broadcast %cst_9 : f32 to vector<1x128xf32>
    %31 = arith.select %24, %29, %30 : vector<1x128xi1>, vector<1x128xf32>
    %c0_10 = arith.constant 0 : index
    %c0_11 = arith.constant 0 : index
    %c0_12 = arith.constant 0 : index
    %c0_13 = arith.constant 0 : index
    %32 = vector.load %arg4[%c0_10, %c0_11, %c0_12, %c0_13] : memref<1x1x1x128xf32, #tpu.memory_space<vmem>>, vector<1x1x1x128xf32>
    %33 = vector.shape_cast %32 : vector<1x1x1x128xf32> to vector<1x128xf32>
    %34 = vector.shape_cast %31 : vector<1x128xf32> to vector<1x1x1x128xf32>
    tpu.vector_store %arg4[%c0_10, %c0_11, %c0_12, %c0_13], %34 {strides = array<i32>} : memref<1x1x1x128xf32, #tpu.memory_space<vmem>>, vector<1x1x1x128xf32>,
    return
  }
  func.func @transform_0(%arg0: i32, %arg1: i32) -> (i32, i32, i32) {
    %c0_i32 = arith.constant 0 : i32
    %c0_i32_0 = arith.constant 0 : i32
    return %arg0, %c0_i32, %arg1 : i32, i32, i32
  }
  func.func @transform_1(%arg0: i32, %arg1: i32) -> (i32, i32, i32) {
    %c0_i32 = arith.constant 0 : i32
    %c0_i32_0 = arith.constant 0 : i32
    return %arg0, %c0_i32, %arg1 : i32, i32, i32
  }
  func.func @transform_2(%arg0: i32, %arg1: i32) -> (i32, i32, i32, i32) {
    %c0_i32 = arith.constant 0 : i32
    %c0_i32_0 = arith.constant 0 : i32
    %c0_i32_1 = arith.constant 0 : i32
    return %arg0, %arg1, %c0_i32, %c0_i32_0 : i32, i32, i32, i32
  }
}

</mosaic_0001>

<bundles_post_ra>
// kernel: tpu_custom_call.1
= control target key start
LH: loop header
LB: loop body
LE: loop exit
PB: predicated region body
PF: predicated region fallthrough
CT: control target
= control target key end

     0   :  { %7 = vsyncpa [#allocation3], 0  ;;  %s832_s0 = inlined_call_operand.hbm [shape: f32[2,4,256], index: 0, kind: input, shape index: {}]   ;;  %s833_s1 = inlined_call_operand.hbm [shape: s32[2,1,256], index: 1, kind: input, shape index: {}]   ;;  %s834_s2 = inlined_call_operand.hbm [shape: f32[2,2,1,128], index: 2, kind: output, shape index: {}]  }
   0x1   :  { %9 = vsyncpa [#allocation3 + $0x1], 0 }
   0x2   :  { %10 = vsyncpa [#allocation6], 0 }
   0x3   :  { %12 = vsyncpa [#allocation6 + $0x1], 0 }
   0x4   :  { %13 = vsyncpa [#allocation4], 0 }
   0x5   :  { %15 = vsyncpa [#allocation4 + $0x1], 0  ;;  %s669_s9 = smov 0   ;;  %s671_s10 = smov 0  }
   0x6   :  { %s673_s11 = smov 0   ;;  %s675_s12 = smov 0  }
   0x7   :  { %s677_s13 = smov 0   ;;  %s679_s14 = smov 0  }
   0x8   :  { %s681_s15 = smov 0   ;;  %s683_s16 = smov 0  }
   0x9 LB: > { %s387_s17 = sadd.s32 4294967295, %s652_s16   ;;  %s388_s18 = sadd.s32 4294967294, %s652_s16   ;;  %s652_s16 = sphi %s683_s16, %s21_s16   ;;  %s648_s15 = sphi %s681_s15, %s846_s15   ;;  %s644_s14 = sphi %s679_s14, %s845_s14   ;;  %s640_s13 = sphi %s677_s13, %s844_s13   ;;  %s636_s12 = sphi %s675_s12, %s843_s12   ;;  %s632_s11 = sphi %s673_s11, %s842_s11   ;;  %s628_s10 = sphi %s671_s10, %s841_s10   ;;  %s624_s9 = sphi %s669_s9, %s840_s9  }
   0xa   : > { %s30_s19 = sadd.s32 1, %s644_s14  ;;  %s33_s20 = sadd.s32 1, %s648_s15 }
   0xb   : > { %p31_p0 = scmp.ge.s32.totalorder %s30_s19, 2  ;;  %s42_s21 = sadd.s32 1, %s632_s11 }
   0xc   : > { %p49_p1 = scmp.ne.s32.totalorder %s632_s11, %s628_s10  ;;  %p50_p2 = scmp.eq.s32.totalorder %s652_s16, 0 }
   0xd   : > { %s848_s19 = smov (%p31_p0, %s30_s19), 0  ;;  %s850_s20 = smov (!%p31_p0, %s33_s20), %s648_s15 }
   0xe   : > { %s38_s22 = ssub.s32 %s644_s14, %s848_s19  ;;  %p722_p3 = por %p50_p2, %p49_p1 }
   0xf   : > { %p35_p4 = scmp.ge.s32.totalorder %s850_s20, 2  ;;  %p55_p5 = scmp.ne.s32.totalorder %s628_s10, %s624_s9 }
  0x10   : > { %p56_p6 = scmp.eq.s32.totalorder %s387_s17, 0  ;;  %p109_p7 = scmp.eq.s32.totalorder %s387_s17, 3 }
  0x11   : > { %s852_s20 = smov (%p35_p4, %s850_s20), 0  ;;  %p115_p10 = scmp.eq.s32.totalorder %s388_s18, 3 }
  0x12   : > { %p730_p8 = por %p56_p6, %p55_p5  ;;  %p734_p9 = por %p109_p7, %p49_p1 }
  0x13   : > { %s37_s26 = ssub.s32 %s648_s15, %s852_s20  ;;  %p740_p12 = por %p115_p10, %p55_p5 }
  0x14   : > { %s39_s27 = sor.u32 %s38_s22, %s37_s26  ;;  %p419_p13 = scmp.lt.s32.totalorder %s652_s16, 4 }
  0x15   : > { %p40_p11 = scmp.eq.s32.totalorder %s39_s27, 0  ;;  %s135_s29 = sand.u32 1, %s632_s11  }
  0x16   : > { %s391_s3 = sshll.u32 %s135_s29, 2  ;;  %s392_s4 = sshll.u32 %s648_s15, 1 }
  0x17   : > { %s747_s30 = scalar_select %p40_p11, %s632_s11, %s42_s21  }
  0x18   : > { %s143_s5 = sadd.s32 %s644_s14, %s392_s4  ;;  %s139_s6 = scalar_lea.vmem [#allocation2], %s391_s3 }
  0x19   : > { %s149_s7 = sshll.u32 %s139_s6, 4  ;;  %s393_s8 = sshll.u32 %s143_s5, 2  ;;  %s150_s7 = int_to_ptr.vmem [resolvable:$true] %s149_s7 }
  0x1a   : > { %s145_s22 = scalar_lea.hbm %s832_s0, %s393_s8  ;;  %p756_p0 = pnand %p419_p13, %p722_p3 }
  0x1b   : > { %s147_s21 = sshll.u32 %s145_s22, 4  ;;  %p395_p1 = scmp.ge.s32.totalorder %s652_s16, 1  ;;  %s148_s21 = int_to_ptr.hbm [resolvable:$true] %s147_s21 }
  0x1c   : > { %s136_s27 = scalar_lea.sflag [#allocation3], %s135_s29  ;;  %p173_p2 = scmp.lt.s32.totalorder %s652_s16, 5 }
  0x1d   : > { %411 = dma.hbm_to_vmem [thread:$0]  (!%p756_p0), %s148_s21, 64, %s150_s7, %s136_s27  }
  0x1e   : > { %s164_s6 = scalar_lea.hbm %s833_s1, %s143_s5  ;;  %p174_p4 = pnand %p395_p1, %p173_p2 }
  0x1f   : > { %s166_s8 = sshll.u32 %s164_s6, 4  ;;  %s159_s23 = scalar_lea.vmem [#allocation5], %s135_s29  ;;  %s167_s8 = int_to_ptr.hbm [resolvable:$true] %s166_s8 }
  0x20   : > { %s168_s17 = sshll.u32 %s159_s23, 4  ;;  %s157_s18 = scalar_lea.sflag [#allocation6], %s135_s29  ;;  %s169_s17 = int_to_ptr.vmem [resolvable:$true] %s168_s17 }
  0x21   : > { %414 = dma.hbm_to_vmem [thread:$0]  (!%p756_p0), %s167_s8, 16, %s169_s17, %s157_s18  }
  0x22   : > { %177 = sbr.rel (%p174_p4) target bundleno = 277 (0x115), region = 28  ;;  %s770_s22 = sand.u32 (!%p174_p4), 1, %s628_s10  }
  0x23   : > { %s396_s7 = sshll.u32 (!%p174_p4), %s770_s22, 2  ;;  %s180_s21 = scalar_lea.sflag (!%p174_p4), [#allocation3], %s770_s22 }
  0x24   : > { %s183_s27 = scalar_lea.vmem (!%p174_p4), [#allocation2], %s396_s7 }
  0x27   : > { %611 = dma.done.wait (%p730_p8), %s180_s21, 64  }
  0x28   : > { %613 = vsyncadd (%p730_p8), %s180_s21, 4294967232  ;;  %s190_s29 = scalar_lea.sflag [#allocation6], %s770_s22  ;;  %s192_s5 = scalar_lea.vmem [#allocation5], %s770_s22 }
  0x29   : > { %615 = dma.done.wait (%p730_p8), %s190_s29, 16  }
  0x2a   : > { %617 = vsyncadd (%p730_p8), %s190_s29, 4294967280  ;;  %vm223_vm0 = vcmask 1043456   ;;  %v217_v0 = vld [vmem:[%s183_s27] sm:$0xf]  ;;  %v219_v5 = vlaneseq  ;;  %vm256_vm2 = vcmask 1040384   ;;  %s397_s24 = sshll.u32 %s640_s13, 1 }
  0x2b   : > { %v224_v1 = vsel %vm223_vm0, %v217_v0, -inf  ;;  %v485_v9 = vld [vmem:[%s192_s5] ss:$0 sm:$0xff]  ;;  %s280_s26 = sadd.s32 %s636_s12, %s397_s24  ;;  %s216_s8 = scalar_lea.vmem [#allocation7], %s770_s22 }
  0x2c   : > { %v225_v2 = vrot.slane %v224_v1, 4  ;;  %v220_v8 = vshrl.u32 %v219_v5, 7  ;;  %v254_v41 = vand.u32 127, %v219_v5  ;;  %s281_s6 = scalar_lea.hbm %s834_s2, %s280_s26  ;;  %s283_s23 = sshll.u32 %s216_s8, 4  ;;  %s284_s23 = int_to_ptr.vmem [resolvable:$true] %s283_s23 }
  0x2d   : > { %s285_s17 = sshll.u32 %s281_s6, 4  ;;  %s271_s7 = scalar_lea.sflag [#allocation4], %s770_s22  ;;  %s286_s17 = int_to_ptr.hbm [resolvable:$true] %s285_s17 }
  0x2e   : > { %v226_v3 = vmax.f32 %v224_v1, %v225_v2  ;;  %vm222_vm1 = vcmp.eq.s32.totalorder %v220_v8, %v485_v9  ;;  %vm255_vm3 = vcmp.eq.s32.totalorder %v254_v41, 0  ;;  %s564_s21 = sshra.s32 %s286_s17, 4  ;;  %s570_s29 = scalar_lea.hbm %s834_s2, 4  ;;  %s565_s21 = int_to_ptr.hbm [resolvable:$true] %s564_s21 }
  0x2f   : > { %v244_v13 = vsel %vm222_vm1, %v217_v0, 0.0  ;;  %s566_s12 = scalar_lea.hbm %s565_s21, 1  ;;  %p571_p7 = scmp.lt.s32.totalorder %s565_s21, %s834_s2 }
  0x30   : > { %v227_v4 = vrot.slane %v226_v3, 2  ;;  %v245_v14 = vsel %vm223_vm0, %v244_v13, 0.0  ;;  %p567_p3 = scmp.ne.s32.totalorder %s565_s21, %s566_s12  ;;  %p572_p8 = scmp.lt.s32.totalorder %s570_s29, %s566_s12 }
  0x31   : > { %v246_v17 = vrot.slane %v245_v14, 4 }
  0x32   : > { %v228_v6 = vmax.f32 %v226_v3, %v227_v4  ;;  %p568_p5 = pnand %p567_p3, %p734_p9  ;;  %p573_p10 = por %p572_p8, %p571_p7 }
  0x33   : > { %v247_v20 = vadd.f32 %v246_v17, %v245_v14 }
  0x34   : > { %v229_v7 = vrot.slane %v228_v6, 1  ;;  %p569_p6 = pneg %p568_p5 }
  0x35   : > { %v248_v23 = vrot.slane %v247_v20, 2 }
  0x36   : > { %v230_v10 = vmax.f32 %v228_v6, %v229_v7  ;;  %p574_p11 = pnand %p573_p10, %p569_p6 }
  0x37   : > { %v249_v26 = vadd.f32 %v248_v23, %v247_v20 }
  0x38   : > { %v231_v11 = vsub.f32 %v217_v0, %v230_v10 }
  0x39   : > { %v250_v27 = vrot.slane %v249_v26, 1 }
  0x3a   : > { %v232_v12 = vmul.f32 1.442695, %v231_v11 }
  0x3b   : > { %v251_v30 = vadd.f32 %v250_v27, %v249_v26 }
  0x3c   : > { %486 = vpow2.f32 %v232_v12 }
  0x42   : > { %v487_v15 = vpop.eup %486 }
  0x43   : > { %v234_v16 = vsel %vm223_vm0, %v487_v15, 0.0 }
  0x44   : > { %v235_v18 = vrot.slane %v234_v16, 4 }
  0x46   : > { %v236_v19 = vadd.f32 %v235_v18, %v234_v16 }
  0x48   : > { %v237_v21 = vrot.slane %v236_v19, 2 }
  0x4a   : > { %v238_v22 = vadd.f32 %v237_v21, %v236_v19 }
  0x4c   : > { %v239_v24 = vrot.slane %v238_v22, 1 }
  0x4e   : > { %v240_v25 = vadd.f32 %v239_v24, %v238_v22 }
  0x50   : > { %488 = vlog2.f32 %v240_v25 }
  0x56   : > { %v489_v28 = vpop.eup %488 }
  0x57   : > { %v242_v29 = vmul.f32 0.6931472, %v489_v28 }
  0x59   : > { %v243_v31 = vadd.f32 %v242_v29, %v230_v10 }
  0x5b   : > { %v252_v32 = vsub.f32 %v243_v31, %v251_v30 }
  0x5d   : > { %v257_v33 = vsel %vm256_vm2, %v252_v32, 0.0 }
  0x5e   : > { %258 = vadd.xlane.f32.xlu0 %v257_v33 }
  0xd1   : > { %v259_v34 = vpop.xlane.xlu0 %258 }
  0xd2   : > { %v260_v35 = vrot.slane %v259_v34, 4 }
  0xd4   : > { %v261_v36 = vadd.f32 %v260_v35, %v259_v34 }
  0xd6   : > { %v262_v37 = vrot.slane %v261_v36, 2 }
  0xd8   : > { %v263_v38 = vadd.f32 %v262_v37, %v261_v36 }
  0xda   : > { %v264_v39 = vrot.slane %v263_v38, 1 }
  0xdc   : > { %v265_v40 = vadd.f32 %v264_v39, %v263_v38 }
  0xde   : > { %400 = vpush %v265_v40 }
 0x10f   : > { %s401_s18 = spop %400 }
 0x110   : > { %v267_v42 = vstv %s401_s18 }
 0x111   : > { %v268_v43 = vsel %vm255_vm3, %v267_v42, 0.0 }
 0x112   : > { %269 = vst [vmem:[%s216_s8] sm:$0x1] %v268_v43 }
 0x113   : > { %577 = shalt.err (!%p574_p11)
}
 0x114   : > { %406 = dma.vmem_to_hbm [thread:$0]  (%p734_p9), %s284_s23, 16, %s286_s17, %s271_s7  }
 0x115 PF: > { %p420_p13 = scmp.ge.s32.totalorder %s652_s16, 2  ;;  %s297_s22 = sand.u32 1, %s624_s9  }
 0x116   : > { %s298_s26 = scalar_lea.sflag [#allocation4], %s297_s22 }
 0x117   : > { %p416_p0 = pnand %p420_p13, %p740_p12 }
 0x119   : > { %p417_p1 = pneg %p416_p0 }
 0x11b   : > { %619 = dma.done.wait (%p417_p1), %s298_s26, 16  }
 0x11c   : > { %621 = vsyncadd (%p417_p1), %s298_s26, 4294967280  ;;  %s21_s16 = sadd.s32 1, %s652_s16   ;;  %s840_s9 = smov %s628_s10 }
 0x11d   : > { %p18_p2 = scmp.ge.s32.totalorder %s21_s16, 6   ;;  %s841_s10 = smov %s632_s11 }
 0x11e   : > { %s842_s11 = smov %s747_s30  ;;  %s843_s12 = smov %s644_s14 }
 0x11f   : > { %s844_s13 = smov %s648_s15  ;;  %s845_s14 = smov %s848_s19 }
 0x120   : > { %s846_s15 = smov %s852_s20  ;;  %20 = sbr.rel (!%p18_p2) target bundleno = 9 (0x9), region = 86 }
 0x125   :  { %303 = vsyncpa [#allocation3], 1 }
 0x126   :  { %305 = vsyncpa [#allocation3 + $0x1], 1 }
 0x127   :  { %306 = vsyncpa [#allocation6], 1 }
 0x128   :  { %308 = vsyncpa [#allocation6 + $0x1], 1 }
 0x129   :  { %309 = vsyncpa [#allocation4], 1 }
 0x12a   :  { %311 = vsyncpa [#allocation4 + $0x1], 1 }

</bundles_post_ra>
